<compile_context>
chip_gen: v5e
topology: v5e:2x2
jax: 0.10.0
libtpu: 0.0.40
codegen_flags: <defaults>
</compile_context>

<pallas_src>
import jax
import jax.numpy as jnp
from jax.experimental import pallas as pl
from jax.experimental.pallas import tpu as pltpu

STATE_SIZE = 8
HIDDEN = 64
ACTION_SIZE = 4
LOGIT_PAD = 128        # in-kernel padded logits width (lane-dense softmax), never hits HBM
TB_DEFAULT = 1024      # batch tile (multiple of 8/16); ~10 steps at B=10k -> good v7x balance


def _round_up(x, m):
    return pl.cdiv(x, m) * m


def actor_kernel(x_ref, w1_ref, b1_ref, w2_ref, b2_ref, w3_ref, b3_ref, out_ref):
    # f32 state read straight from HBM; cast to bf16 on the VPU (free under DMA).
    x = x_ref[...].astype(jnp.bfloat16)                                # (TB, S)

    # fc1 + ReLU  (bf16 MXU matmul, f32 accumulate / bias / activation)
    h1 = jnp.dot(x, w1_ref[...], preferred_element_type=jnp.float32) + b1_ref[...]
    h1 = jnp.maximum(h1, 0.0).astype(jnp.bfloat16)

    # fc2 + ReLU
    h2 = jnp.dot(h1, w2_ref[...], preferred_element_type=jnp.float32) + b2_ref[...]
    h2 = jnp.maximum(h2, 0.0).astype(jnp.bfloat16)

    # fc3 with 128 lane-dense padded columns (zero weights, bias = -1e30 -> exp()==0),
    # stable softmax in f32 over the padded width (exactly equals softmax over the
    # first ACTION_SIZE columns).
    logits = jnp.dot(h2, w3_ref[...], preferred_element_type=jnp.float32) + b3_ref[...]
    m = jnp.max(logits, axis=-1, keepdims=True)
    e = jnp.exp(logits - m)
    denom = jnp.sum(e, axis=-1, keepdims=True)
    probs = e * pl.reciprocal(denom, approx=True)   # EUP vrcp slot, ~1e-3 rel err

    # Only the real action columns ever leave VMEM.
    out_ref[...] = probs[:, :ACTION_SIZE]


def prepare_params(params):
    """One-time parameter prep: fc3 padded to 128 lane-dense columns, weights -> bf16."""
    w1, b1, w2, b2, w3, b3 = params
    w3p = jnp.zeros((HIDDEN, LOGIT_PAD), jnp.float32).at[:, :ACTION_SIZE].set(w3)
    b3p = jnp.full((1, LOGIT_PAD), -1e30, jnp.float32).at[:, :ACTION_SIZE].set(b3)
    return (w1.astype(jnp.bfloat16), b1,
            w2.astype(jnp.bfloat16), b2,
            w3p.astype(jnp.bfloat16), b3p)


def actor_forward(state, prepped, *, tb=TB_DEFAULT):
    """state: (B, STATE_SIZE) float32 -> action_probs (B, ACTION_SIZE) float32.

    `prepped` must come from prepare_params(params).
    """
    w1b, b1, w2b, b2, w3b, b3p = prepped
    B = state.shape[0]

    # Batch tiling: tile no larger than (B rounded to the 8-sublane granule); no
    # explicit padding — Pallas masks the boundary block of a non-divisible grid.
    tb = int(min(tb, _round_up(B, 8)))
    grid = (pl.cdiv(B, tb),)

    const = lambda i: (0, 0)  # weights/biases: same block every step -> stay VMEM-resident
    out = pl.pallas_call(
        actor_kernel,
        out_shape=jax.ShapeDtypeStruct((B, ACTION_SIZE), jnp.float32),
        grid=grid,
        in_specs=[
            pl.BlockSpec((tb, STATE_SIZE), lambda i: (i, 0)),
            pl.BlockSpec((STATE_SIZE, HIDDEN), const),
            pl.BlockSpec((1, HIDDEN), const),
            pl.BlockSpec((HIDDEN, HIDDEN), const),
            pl.BlockSpec((1, HIDDEN), const),
            pl.BlockSpec((HIDDEN, LOGIT_PAD), const),
            pl.BlockSpec((1, LOGIT_PAD), const),
        ],
        out_specs=pl.BlockSpec((tb, ACTION_SIZE), lambda i: (i, 0)),
        compiler_params=pltpu.CompilerParams(
            dimension_semantics=("parallel",),  # shard batch tiles across TCs on v7x
        ),
    )(state, w1b, b1, w2b, b2, w3b, b3p)
    return out


def init_params(key):
    """Deterministic init mimicking PyTorch Linear default (uniform +/- 1/sqrt(fan_in))."""
    def linear(k, fan_in, fan_out):
        kw, kb = jax.random.split(k)
        bound = 1.0 / jnp.sqrt(jnp.float32(fan_in))
        # stored as (in, out) so the kernel does x @ W, matching PyTorch's x @ W.T
        w = jax.random.uniform(kw, (fan_in, fan_out), jnp.float32, -bound, bound)
        b = jax.random.uniform(kb, (1, fan_out), jnp.float32, -bound, bound)
        return w, b

    k1, k2, k3 = jax.random.split(key, 3)
    w1, b1 = linear(k1, STATE_SIZE, HIDDEN)
    w2, b2 = linear(k2, HIDDEN, HIDDEN)
    w3, b3 = linear(k3, HIDDEN, ACTION_SIZE)
    return w1, b1, w2, b2, w3, b3


def actor_forward_ref(state, params, *, match_kernel_precision=False):
    """Pure-JAX reference. match_kernel_precision=True mirrors the kernel's bf16 matmul
    inputs + f32 accumulation for a tight comparison."""
    w1, b1, w2, b2, w3, b3 = params
    if match_kernel_precision:
        dot = lambda a, b: jnp.dot(a.astype(jnp.bfloat16), b.astype(jnp.bfloat16),
                                   preferred_element_type=jnp.float32)
    else:
        dot = lambda a, b: jnp.dot(a, b, preferred_element_type=jnp.float32)
    h1 = jnp.maximum(dot(state, w1) + b1, 0.0)
    h2 = jnp.maximum(dot(h1, w2) + b2, 0.0)
    return jax.nn.softmax(dot(h2, w3) + b3, axis=-1)


if __name__ == "__main__":
    key = jax.random.PRNGKey(0)
    pkey, skey, lkey = jax.random.split(key, 3)
    params = init_params(pkey)
    prepped = prepare_params(params)   # hoisted one-time weight prep

    # Small batch (module-sized example).
    batch = 2
    state = jax.random.normal(skey, (batch, STATE_SIZE), dtype=jnp.float32)
    probs = actor_forward(state, prepped)
    jax.block_until_ready(probs)

    ref_matched = actor_forward_ref(state, params, match_kernel_precision=True)
    ref_f32 = actor_forward_ref(state, params, match_kernel_precision=False)
    # Tolerances loosened for approx reciprocal (~1e-3 rel) on top of bf16 matmuls.
    assert probs.shape == (batch, ACTION_SIZE)
    assert jnp.allclose(jnp.sum(probs, axis=-1), 1.0, atol=3e-3)
    assert jnp.allclose(probs, ref_matched, atol=3e-3, rtol=3e-3)
    assert jnp.allclose(probs, ref_f32, atol=5e-2)

    # Larger, non-multiple batch: exercises multiple grid steps + masked boundary block.
    big_b = 10000
    big_state = jax.random.normal(lkey, (big_b, STATE_SIZE), dtype=jnp.float32)
    big_probs = actor_forward(big_state, prepped)
    jax.block_until_ready(big_probs)
    big_ref = actor_forward_ref(big_state, params, match_kernel_precision=True)
    assert big_probs.shape == (big_b, ACTION_SIZE)
    assert jnp.allclose(jnp.sum(big_probs, axis=-1), 1.0, atol=3e-3)
    assert jnp.allclose(big_probs, big_ref, atol=3e-3, rtol=3e-3)

    print("KERNEL_OK")
</pallas_src>

<mosaic_0001>
module attributes {stable_mosaic.version = 11 : i64} {
  func.func @actor_kernel(%arg0: i32, %arg1: memref<8x8xf32, #tpu.memory_space<vmem>>, %arg2: memref<8x64xbf16, #tpu.memory_space<vmem>>, %arg3: memref<1x64xf32, #tpu.memory_space<vmem>>, %arg4: memref<64x64xbf16, #tpu.memory_space<vmem>>, %arg5: memref<1x64xf32, #tpu.memory_space<vmem>>, %arg6: memref<64x128xbf16, #tpu.memory_space<vmem>>, %arg7: memref<1x128xf32, #tpu.memory_space<vmem>>, %arg8: memref<8x4xf32, #tpu.memory_space<vmem>>) attributes {dimension_semantics = [#tpu.dimension_semantics<parallel>], iteration_bounds = array<i64: 1>, scalar_prefetch = 0 : i64, scratch_operands = 0 : i64, tpu.core_type = #tpu.core_type<tc>, window_params = [{transform_indices = @transform_0, window_bounds = array<i64: 8, 8>}, {pipeline_mode = #tpu.pipeline_mode<synchronous>, transform_indices = @transform_1, window_bounds = array<i64: 8, 64>}, {pipeline_mode = #tpu.pipeline_mode<synchronous>, transform_indices = @transform_2, window_bounds = array<i64: 1, 64>}, {pipeline_mode = #tpu.pipeline_mode<synchronous>, transform_indices = @transform_3, window_bounds = array<i64: 64, 64>}, {pipeline_mode = #tpu.pipeline_mode<synchronous>, transform_indices = @transform_4, window_bounds = array<i64: 1, 64>}, {pipeline_mode = #tpu.pipeline_mode<synchronous>, transform_indices = @transform_5, window_bounds = array<i64: 64, 128>}, {pipeline_mode = #tpu.pipeline_mode<synchronous>, transform_indices = @transform_6, window_bounds = array<i64: 1, 128>}, {transform_indices = @transform_7, window_bounds = array<i64: 8, 4>}]} {
    %c0 = arith.constant 0 : index
    %c0_0 = arith.constant 0 : index
    %0 = vector.load %arg1[%c0, %c0_0] : memref<8x8xf32, #tpu.memory_space<vmem>>, vector<8x8xf32>
    %1 = arith.truncf %0 : vector<8x8xf32> to vector<8x8xbf16>
    %c0_1 = arith.constant 0 : index
    %c0_2 = arith.constant 0 : index
    %2 = vector.load %arg2[%c0_1, %c0_2] : memref<8x64xbf16, #tpu.memory_space<vmem>>, vector<8x64xbf16>
    %cst = arith.constant dense<0.000000e+00> : vector<8x64xf32>
    %3 = tpu.matmul %1, %2, %cst {dimension_numbers = #tpu.dot_dimension_numbers<[1], [0], [0], [1], [0, 0, 1, 1], [], []>} : vector<8x8xbf16>, vector<8x64xbf16>, vector<8x64xf32> -> vector<8x64xf32>
    %c0_3 = arith.constant 0 : index
    %c0_4 = arith.constant 0 : index
    %4 = vector.load %arg3[%c0_3, %c0_4] : memref<1x64xf32, #tpu.memory_space<vmem>>, vector<1x64xf32>
    %5 = vector.broadcast %4 : vector<1x64xf32> to vector<8x64xf32>
    %6 = arith.addf %3, %5 : vector<8x64xf32>
    %cst_5 = arith.constant 0.000000e+00 : f32
    %7 = vector.broadcast %cst_5 : f32 to vector<8x64xf32>
    %8 = arith.maximumf %6, %7 : vector<8x64xf32>
    %9 = arith.truncf %8 : vector<8x64xf32> to vector<8x64xbf16>
    %c0_6 = arith.constant 0 : index
    %c0_7 = arith.constant 0 : index
    %10 = vector.load %arg4[%c0_6, %c0_7] : memref<64x64xbf16, #tpu.memory_space<vmem>>, vector<64x64xbf16>
    %cst_8 = arith.constant dense<0.000000e+00> : vector<8x64xf32>
    %11 = tpu.matmul %9, %10, %cst_8 {dimension_numbers = #tpu.dot_dimension_numbers<[1], [0], [0], [1], [0, 0, 1, 1], [], []>} : vector<8x64xbf16>, vector<64x64xbf16>, vector<8x64xf32> -> vector<8x64xf32>
    %c0_9 = arith.constant 0 : index
    %c0_10 = arith.constant 0 : index
    %12 = vector.load %arg5[%c0_9, %c0_10] : memref<1x64xf32, #tpu.memory_space<vmem>>, vector<1x64xf32>
    %13 = vector.broadcast %12 : vector<1x64xf32> to vector<8x64xf32>
    %14 = arith.addf %11, %13 : vector<8x64xf32>
    %cst_11 = arith.constant 0.000000e+00 : f32
    %15 = vector.broadcast %cst_11 : f32 to vector<8x64xf32>
    %16 = arith.maximumf %14, %15 : vector<8x64xf32>
    %17 = arith.truncf %16 : vector<8x64xf32> to vector<8x64xbf16>
    %c0_12 = arith.constant 0 : index
    %c0_13 = arith.constant 0 : index
    %18 = vector.load %arg6[%c0_12, %c0_13] : memref<64x128xbf16, #tpu.memory_space<vmem>>, vector<64x128xbf16>
    %cst_14 = arith.constant dense<0.000000e+00> : vector<8x128xf32>
    %19 = tpu.matmul %17, %18, %cst_14 {dimension_numbers = #tpu.dot_dimension_numbers<[1], [0], [0], [1], [0, 0, 1, 1], [], []>} : vector<8x64xbf16>, vector<64x128xbf16>, vector<8x128xf32> -> vector<8x128xf32>
    %c0_15 = arith.constant 0 : index
    %c0_16 = arith.constant 0 : index
    %20 = vector.load %arg7[%c0_15, %c0_16] : memref<1x128xf32, #tpu.memory_space<vmem>>, vector<1x128xf32>
    %21 = vector.broadcast %20 : vector<1x128xf32> to vector<8x128xf32>
    %22 = arith.addf %19, %21 : vector<8x128xf32>
    %cst_17 = arith.constant dense<0xFF800000> : vector<8xf32>
    %23 = vector.multi_reduction <maximumf>, %22, %cst_17 [1] : vector<8x128xf32> to vector<8xf32>
    %24 = vector.shape_cast %23 : vector<8xf32> to vector<8x1xf32>
    %25 = vector.broadcast %24 : vector<8x1xf32> to vector<8x128xf32>
    %26 = arith.subf %22, %25 : vector<8x128xf32>
    %27 = math.exp %26 : vector<8x128xf32>
    %cst_18 = arith.constant dense<0.000000e+00> : vector<8xf32>
    %28 = vector.multi_reduction <add>, %27, %cst_18 [1] : vector<8x128xf32> to vector<8xf32>
    %29 = vector.shape_cast %28 : vector<8xf32> to vector<8x1xf32>
    %30 = tpu.reciprocal %29 {approx = true} : vector<8x1xf32> -> vector<8x1xf32>
    %31 = vector.broadcast %30 : vector<8x1xf32> to vector<8x128xf32>
    %32 = arith.mulf %27, %31 : vector<8x128xf32>
    %33 = vector.extract_strided_slice %32 {offsets = [0, 0], sizes = [8, 4], strides = [1, 1]} : vector<8x128xf32> to vector<8x4xf32>
    %c0_19 = arith.constant 0 : index
    %c0_20 = arith.constant 0 : index
    %34 = vector.load %arg8[%c0_19, %c0_20] : memref<8x4xf32, #tpu.memory_space<vmem>>, vector<8x4xf32>
    tpu.vector_store %arg8[%c0_19, %c0_20], %33 {strides = array<i32>} : memref<8x4xf32, #tpu.memory_space<vmem>>, vector<8x4xf32>,
    return
  }
  func.func @transform_0(%arg0: i32) -> (i32, i32) {
    %c0_i32 = arith.constant 0 : i32
    %c0_i32_0 = arith.constant 0 : i32
    return %arg0, %c0_i32 : i32, i32
  }
  func.func @transform_1(%arg0: i32) -> (i32, i32) {
    %c0_i32 = arith.constant 0 : i32
    %c0_i32_0 = arith.constant 0 : i32
    %c0_i32_1 = arith.constant 0 : i32
    return %c0_i32, %c0_i32_0 : i32, i32
  }
  func.func @transform_2(%arg0: i32) -> (i32, i32) {
    %c0_i32 = arith.constant 0 : i32
    %c0_i32_0 = arith.constant 0 : i32
    %c0_i32_1 = arith.constant 0 : i32
    return %c0_i32, %c0_i32_0 : i32, i32
  }
  func.func @transform_3(%arg0: i32) -> (i32, i32) {
    %c0_i32 = arith.constant 0 : i32
    %c0_i32_0 = arith.constant 0 : i32
    %c0_i32_1 = arith.constant 0 : i32
    return %c0_i32, %c0_i32_0 : i32, i32
  }
  func.func @transform_4(%arg0: i32) -> (i32, i32) {
    %c0_i32 = arith.constant 0 : i32
    %c0_i32_0 = arith.constant 0 : i32
    %c0_i32_1 = arith.constant 0 : i32
    return %c0_i32, %c0_i32_0 : i32, i32
  }
  func.func @transform_5(%arg0: i32) -> (i32, i32) {
    %c0_i32 = arith.constant 0 : i32
    %c0_i32_0 = arith.constant 0 : i32
    %c0_i32_1 = arith.constant 0 : i32
    return %c0_i32, %c0_i32_0 : i32, i32
  }
  func.func @transform_6(%arg0: i32) -> (i32, i32) {
    %c0_i32 = arith.constant 0 : i32
    %c0_i32_0 = arith.constant 0 : i32
    %c0_i32_1 = arith.constant 0 : i32
    return %c0_i32, %c0_i32_0 : i32, i32
  }
  func.func @transform_7(%arg0: i32) -> (i32, i32) {
    %c0_i32 = arith.constant 0 : i32
    %c0_i32_0 = arith.constant 0 : i32
    return %arg0, %c0_i32 : i32, i32
  }
}

</mosaic_0001>

<bundles_post_ra>
// kernel: tpu_custom_call.1
= control target key start
LH: loop header
LB: loop body
LE: loop exit
PB: predicated region body
PF: predicated region fallthrough
CT: control target
= control target key end

     0   :  { %12 = vsyncpa [#allocation3], 0  ;;  %s524_s0 = inlined_call_operand.hbm [shape: f32[2,8], index: 0, kind: input, shape index: {}]   ;;  %s525_s1 = inlined_call_operand.hbm [shape: bf16[8,64], index: 1, kind: input, shape index: {}]   ;;  %s526_s2 = inlined_call_operand.vmem [shape: f32[1,64], index: 2, kind: input, shape index: {}]   ;;  %s527_s3 = inlined_call_operand.hbm [shape: bf16[64,64], index: 3, kind: input, shape index: {}]   ;;  %s528_s4 = inlined_call_operand.vmem [shape: f32[1,64], index: 4, kind: input, shape index: {}]   ;;  %s529_s5 = inlined_call_operand.hbm [shape: bf16[64,128], index: 5, kind: input, shape index: {}]   ;;  %s530_s6 = inlined_call_operand.vmem [shape: f32[1,128], index: 6, kind: input, shape index: {}]   ;;  %s531_s7 = inlined_call_operand.hbm [shape: f32[2,4], index: 7, kind: output, shape index: {}]  }
   0x1   :  { %13 = vsyncpa [#allocation6], 0 }
   0x2   :  { %14 = vsyncpa [#allocation9], 0 }
   0x3   :  { %15 = vsyncpa [#allocation4], 0  ;;  %s34_s26 = sshll.u32 %s525_s1, 4  ;;  %s35_s26 = int_to_ptr.hbm [resolvable:$true] %s34_s26 }
   0x4   :  { %19 = vsyncadd [#allocation3], 96  ;;  %s445_s27 = smov [#allocation5]   ;;  %s20_s8 = sshll.u32 %s524_s0, 4  ;;  %s21_s8 = int_to_ptr.hbm [resolvable:$true] %s20_s8 }
   0x5   :  { %s36_s28 = sshll.u32 %s445_s27, 4  ;;  %s446_s9 = smov [#allocation2]   ;;  %s37_s28 = int_to_ptr.vmem [resolvable:$true] %s36_s28 }
   0x6   :  { %39 = dma.hbm_to_vmem [thread:$0]  %s35_s26, 64, %s37_s28, [#allocation6]  }
   0x7   :  { %s22_s10 = sshll.u32 %s446_s9, 4  ;;  %s447_s11 = smov 32   ;;  %s23_s10 = int_to_ptr.vmem [resolvable:$true] %s22_s10 }
   0x8   :  { %s448_s12 = smov 2   ;;  %s46_s14 = sshll.u32 %s527_s3, 4  ;;  %s47_s14 = int_to_ptr.hbm [resolvable:$true] %s46_s14 }
   0x9   :  { %28 = dma.hbm_to_vmem [thread:$0]  %s21_s8, 32, %s23_s10, [#allocation3], %s447_s11, %s447_s11, %s448_s12  }
   0xa   :  { %s449_s15 = smov [#allocation7]   ;;  %s61_s18 = sshll.u32 %s529_s5, 4  ;;  %s62_s18 = int_to_ptr.hbm [resolvable:$true] %s61_s18 }
   0xb   :  { %s48_s16 = sshll.u32 %s449_s15, 4  ;;  %s450_s19 = smov 64   ;;  %s49_s16 = int_to_ptr.vmem [resolvable:$true] %s48_s16 }
   0xc   :  { %s451_s20 = smov 4   ;;  %s452_s21 = smov [#allocation8]  }
   0xd   :  { %54 = dma.hbm_to_vmem [thread:$0]  %s47_s14, 512, %s49_s16, [#allocation6], %s450_s19, %s450_s19, %s451_s20  }
   0xe   :  { %s63_s22 = sshll.u32 %s452_s21, 4  ;;  %s64_s22 = int_to_ptr.vmem [resolvable:$true] %s63_s22 }
   0xf   :  { %69 = dma.hbm_to_vmem [thread:$0]  %s62_s18, 512, %s64_s22, [#allocation9], %s450_s19, %s450_s19, %s451_s20  }
  0x10   :  { %437 = dma.done.wait [#allocation3], 128  }
  0x11   :  { %438 = vsyncadd [#allocation3], 4294967168 }
  0x12   :  { %439 = dma.done.wait [#allocation6], 576  }
  0x13   :  { %440 = vsyncadd [#allocation6], 4294966720 }
  0x14   :  { %441 = dma.done.wait [#allocation9], 512  }
  0x15   :  { %442 = vsyncadd [#allocation9], 4294966784  ;;  %vm100_vm0 = vcmask 1043456   ;;  %v91_v0 = vld [vmem:[#allocation5] sm:$0xf]  ;;  %v89_v1 = vld [vmem:[#allocation2] sm:$0xff] }
  0x16   :  { %v296_v2 = vld [vmem:[#allocation7 + $0x18] sm:$0xff]  ;;  %v102_v3 = vsel %vm100_vm0, %v91_v0, 0  ;;  %v90_v4 = vpack.c.bf16 %v89_v1, %v89_v1  ;;  %vm96_vm1 = vcmask 64512   ;;  %v295_v5 = vld [vmem:[#allocation7 + $0x10] sm:$0xff]  ;;  %v294_v6 = vld [vmem:[#allocation7 + $0x8] sm:$0xff]  ;;  %vm155_vm2 = vcmask 523264  }
  0x17   :  { %111 = vmatpush.bf16.msra.mxu0 %v102_v3  ;;  %163 = vmatpush.bf16.msra.mxu1 %v296_v2  ;;  %v293_v7 = vld [vmem:[#allocation7] sm:$0xff]  ;;  %v300_v8 = vld [vmem:[#allocation8 + $0x18] sm:$0xff]  ;;  %v299_v9 = vld [vmem:[#allocation8 + $0x10] sm:$0xff]  ;;  %vm235_vm3 = vcmask 31744  }
  0x18   :  { %217 = vmatpush.bf16.msra.mxu2 %v300_v8  ;;  %v310_v10 = vld [vmem:[%s526_s2] ss:$0 sm:$0xff]  ;;  %v298_v16 = vld [vmem:[#allocation8 + $0x8] sm:$0xff]  ;;  %v297_v17 = vld [vmem:[#allocation8] sm:$0xff] }
  0x19   :  { %v311_v18 = vld [vmem:[%s528_s4] ss:$0 sm:$0xff] }
  0x1a   :  { %258 = vmatmul.msk.bf16.vlgmr.msra.gmra.mxu0 %vm96_vm1, %v90_v4  ;;  %v312_v24 = vld [vmem:[%s530_s6] ss:$0 sm:$0xff] }
  0x1b   :  { %164 = vmatpush.bf16.msra.mxu1 %v295_v5 }
  0x1c   :  { %218 = vmatpush.bf16.msra.mxu2 %v299_v9 }
  0x1f   :  { %165 = vmatpush.bf16.msra.mxu1 %v294_v6 }
  0x20   :  { %219 = vmatpush.bf16.msra.mxu2 %v298_v16 }
  0x23   :  { %166 = vmatpush.bf16.msra.mxu1 %v293_v7 }
  0x24   :  { %220 = vmatpush.bf16.msra.mxu2 %v297_v17 }
  0x97   :  { %v113_v11 = vpop.f32.mrf.mxu0 }
  0x98   :  { %v114_v12 = vadd.f32 %v310_v10, %v113_v11 }
  0x9a   :  { %v117_v13 = vmax.f32 %v114_v12, 0.0 }
  0x9c   :  { %v118_v14 = vpack.c.bf16 %v117_v13, %v117_v13 }
  0x9e   :  { %275 = vmatmul.msk.bf16.vlgmr.msra.gmra.mxu1 %vm155_vm2, %v118_v14 }
  0x9f   :  { %v115_v15 = vpop.f32.mrf.mxu0 }
 0x11b   :  { %v168_v19 = vpop.f32.mrf.mxu1 }
 0x11c   :  { %v169_v20 = vadd.f32 %v311_v18, %v168_v19 }
 0x11e   :  { %v172_v21 = vmax.f32 %v169_v20, 0.0 }
 0x120   :  { %v173_v22 = vpack.c.bf16 %v172_v21, %v172_v21 }
 0x122   :  { %292 = vmatmul.msk.bf16.vlgmr.msra.gmra.mxu2 %vm155_vm2, %v173_v22 }
 0x123   :  { %v170_v23 = vpop.f32.mrf.mxu1 }
 0x1a5   :  { %v222_v25 = vpop.f32.mrf.mxu2 }
 0x1a6   :  { %v223_v26 = vadd.f32 %v312_v24, %v222_v25 }
 0x1a8   :  { %226 = vmax.xlane.f32.xlu0 %v223_v26 }
 0x1ad   :  { %v224_v27 = vpop.f32.mrf.mxu2 }
 0x21b   :  { %v227_v28 = vpop.xlane.xlu0 %226 }
 0x21c   :  { %v228_v29 = vsub.f32 %v223_v26, %v227_v28 }
 0x21e   :  { %v229_v30 = vmul.f32 1.442695, %v228_v29 }
 0x220   :  { %313 = vpow2.f32 %v229_v30 }
 0x226   :  { %v314_v31 = vpop.eup %313 }
 0x227   :  { %231 = vadd.xlane.f32.xlu0 %v314_v31 }
 0x29a   :  { %v232_v32 = vpop.xlane.xlu0 %231 }
 0x29b   :  { %315 = vrcp.f32 %v232_v32 }
 0x2a1   :  { %v316_v33 = vpop.eup %315 }
 0x2a2   :  { %v234_v34 = vmul.f32 %v316_v33, %v314_v31 }
 0x2a4   :  { %236 = vst.msk [vmem:[#allocation10] sm:$0xff] %vm235_vm3, %v234_v34 }
 0x2a5   :  { %240 = vsyncadd [#allocation4], 96  ;;  %s243_s6 = sshll.u32 %s531_s7, 4  ;;  %s453_s27 = smov [#allocation10]   ;;  %s244_s6 = int_to_ptr.hbm [resolvable:$true] %s243_s6 }
 0x2a6   :  { %s241_s28 = sshll.u32 %s453_s27, 4  ;;  %s242_s28 = int_to_ptr.vmem [resolvable:$true] %s241_s28 }
 0x2a7   :  { %249 = dma.vmem_to_hbm [thread:$0]  %s242_s28, 32, %s244_s6, [#allocation4], %s447_s11, %s447_s11, %s448_s12  }
 0x2a8   :  { %443 = dma.done.wait [#allocation4], 128  }
 0x2a9   :  { %444 = vsyncadd [#allocation4], 4294967168 }
 0x2aa   :  { %254 = vsyncpa [#allocation3], 1 }
 0x2ab   :  { %255 = vsyncpa [#allocation6], 1 }
 0x2ac   :  { %256 = vsyncpa [#allocation9], 1 }
 0x2ad   :  { %257 = vsyncpa [#allocation4], 1 }

</bundles_post_ra>
